<compile_context>
chip_gen: v7x
topology: tpu7x:2x2x1
jax: 0.10.0
libtpu: 0.0.40
codegen_flags: <defaults>
</compile_context>

<pallas_src>
import jax
import jax.numpy as jnp
from jax.experimental import pallas as pl
from jax.experimental.pallas import tpu as pltpu


def _lconv_grid_kernel(xg_ref, l_ref, wblk_ref, b_ref, o_ref, s_ref):
    # xg_ref : (B, Cin, I, TD)      bf16  pre-gathered neighborhoods (streamed over d)
    # l_ref  : (K, I, TD)           bf16  L coefficients (elementwise in d, streamed)
    # wblk_ref:(B*Cout, B*K*Cin)    f32   block-diagonal weight (resident)
    # b_ref  : (B*Cout, 1)          f32   bias, tiled over batch (resident)
    # o_ref  : (B, Cout, TD)        f32
    # s_ref  : (B*K*Cin, TD)        f32   VMEM scratch for the neighbor-contracted stream
    B, Cin, I, TD = xg_ref.shape
    K = l_ref.shape[0]
    KC = K * Cin

    # --- neighbor contraction (VPU multiply + sublane reduce over i) ---
    # Re-slice the refs per (b, k): VMEM loads are cheap (3 vld/cycle) and this keeps
    # peak live vregs at ~one (Cin, I, TD) product instead of the whole K-unrolled tile.
    for b in range(B):
        for k in range(K):
            xb = xg_ref[b].astype(jnp.float32)                 # (Cin, I, TD)
            lk = l_ref[k].astype(jnp.float32)[None, :, :]      # (1,   I, TD)
            # s[b, k*Cin + c, d] = sum_i x[b,c,idx[d,i]] * L[d,i,k]
            s_ref[pl.ds(b * KC + k * Cin, Cin), :] = jnp.sum(xb * lk, axis=1)

    # --- channel contraction (one MXU call for all batches, block-diagonal W) ---
    out = jnp.dot(wblk_ref[...], s_ref[...], preferred_element_type=jnp.float32)
    out = out + b_ref[...]                                      # bias added once
    o_ref[...] = out.reshape(o_ref.shape).astype(o_ref.dtype)


def _pick_td(D, *, td_max=1024, min_steps=4):
    """Largest lane tile (multiple of 128, <= td_max) keeping >= min_steps grid steps."""
    if D <= 256 or D % 128 != 0:
        # Small / awkward D: single full-extent block (full-dim exemption applies).
        return D
    td = 128
    while (td * 2 <= td_max) and (D % (td * 2) == 0) and (D // (td * 2) >= min_steps):
        td *= 2
    return td


def _vmem_limit_bytes(needed_bytes):
    try:
        cap = pltpu.get_tpu_info().vmem_capacity_bytes
    except Exception:
        cap = 64 << 20  # conservative: v7x per-core physical VMEM
    lim = min(max(needed_bytes, 16 << 20), cap - (16 << 20))
    return int(max(lim, 16 << 20))


def lconv_grid(x, idx, L_sparse, W, b, *, td=None, stream_dtype=jnp.bfloat16):
    """x: (B, Cin, D) f32; idx: (D, I) int32; L_sparse: (D, I, K); W: (K, Cin, Cout); b: (1, Cout, 1)."""
    B, Cin, D = x.shape
    Dn, I = idx.shape
    K = L_sparse.shape[-1]
    Cout = W.shape[-1]
    KC = K * Cin
    assert Dn == D

    td = _pick_td(D) if td is None else min(td, D)
    assert D % td == 0, (D, td)
    assert td % 128 == 0 or td == D, "lane tile must be a multiple of 128 (or the full D)"

    # ---- glue (plain JAX): gather neighborhoods + layout transforms ----
    # Cast the two big streamed operands to bf16 *before* the gather so both the
    # gather write and the kernel read are half-width. W / bias stay f32 (tiny,
    # resident) so the MXU accumulation path is f32 end to end.
    xs = x.astype(stream_dtype)
    xg = xs[:, :, idx.T]                                             # (B, Cin, I, D): xg[b,c,i,d] = x[b,c,idx[d,i]]
    Lt = jnp.transpose(L_sparse, (2, 1, 0)).astype(stream_dtype)     # (K, I, D):      Lt[k,i,d]  = L[d,i,k]
    Wt = jnp.transpose(W, (2, 0, 1)).reshape(Cout, KC)               # Wt[o, k*Cin+c] = W[k,c,o]
    Wt = Wt.astype(jnp.float32)
    W_blk = jnp.kron(jnp.eye(B, dtype=jnp.float32), Wt)              # (B*Cout, B*KC) block-diagonal
    b_blk = jnp.tile(b.reshape(Cout, 1).astype(jnp.float32), (B, 1)) # (B*Cout, 1)

    # VMEM budget: double-buffered streamed blocks + resident W/bias + f32 s scratch,
    # plus slack; clamped generation-aware (see _vmem_limit_bytes).
    bytes_xg = B * Cin * I * td * xg.dtype.itemsize
    bytes_l = K * I * td * Lt.dtype.itemsize
    bytes_out = B * Cout * td * x.dtype.itemsize
    bytes_res = W_blk.size * 4 + b_blk.size * 4 + B * KC * td * 4
    vmem_limit = _vmem_limit_bytes(2 * (bytes_xg + bytes_l + bytes_out) + bytes_res + (4 << 20))

    return pl.pallas_call(
        _lconv_grid_kernel,
        out_shape=jax.ShapeDtypeStruct((B, Cout, D), x.dtype),
        grid=(D // td,),
        in_specs=[
            pl.BlockSpec((B, Cin, I, td), lambda j: (0, 0, 0, j)),   # xg, streamed over d (bf16)
            pl.BlockSpec((K, I, td), lambda j: (0, 0, j)),           # L,  streamed over d (bf16)
            pl.BlockSpec((B * Cout, B * KC), lambda j: (0, 0)),      # block-diag W, resident (f32)
            pl.BlockSpec((B * Cout, 1), lambda j: (0, 0)),           # bias, resident (f32)
        ],
        out_specs=pl.BlockSpec((B, Cout, td), lambda j: (0, 0, j)),
        scratch_shapes=[pltpu.VMEM((B * KC, td), jnp.float32)],
        compiler_params=pltpu.CompilerParams(
            dimension_semantics=("parallel",),
            vmem_limit_bytes=vmem_limit,
        ),
    )(xg, Lt, W_blk, b_blk)


if __name__ == "__main__":
    key = jax.random.PRNGKey(0)
    B, Cin, Cout, K, I = 2, 4, 8, 4, 8
    side = 32
    D = side * side          # 1024 grid points -> td=256, grid=(4,): >=2 steps per v7x TC

    # Inferred-grid neighbor indices: 8-neighborhood on a 32x32 torus.
    r = jnp.arange(D) // side
    c = jnp.arange(D) % side
    offs = [(0, 1), (0, -1), (1, 0), (-1, 0), (1, 1), (1, -1), (-1, 1), (-1, -1)]
    idx = jnp.stack(
        [((r + dr) % side) * side + ((c + dc) % side) for dr, dc in offs], axis=-1
    ).astype(jnp.int32)                                                # (D, I)

    # Deterministic kaiming-style (fan_in) parameter init, matching module shapes.
    kx, kl, kw, kb = jax.random.split(key, 4)
    x = jax.random.normal(kx, (B, Cin, D), dtype=jnp.float32)
    L_sparse = jax.random.normal(kl, (D, I, K), jnp.float32) * (2.0 / (I * K)) ** 0.5
    W = jax.random.normal(kw, (K, Cin, Cout), jnp.float32) * (2.0 / (Cin * Cout)) ** 0.5
    b = jax.random.normal(kb, (1, Cout, 1), jnp.float32) * (2.0 / Cout) ** 0.5

    out = jax.block_until_ready(lconv_grid(x, idx, L_sparse, W, b))

    # Pure-JAX f32 reference (matches the PyTorch einsum semantics exactly).
    # Tolerance accounts for bf16 streaming of xg / L (accumulation stays f32).
    ref = jnp.einsum('bcdi,dik,kco->bod', x[:, :, idx], L_sparse, W) + b
    assert out.shape == (B, Cout, D), out.shape
    assert jnp.allclose(out, ref, rtol=3e-2, atol=3e-2), float(jnp.max(jnp.abs(out - ref)))
    print("KERNEL_OK")
</pallas_src>

<mosaic_0001>
module attributes {stable_mosaic.version = 11 : i64} {
  func.func @_lconv_grid_kernel(%arg0: i32, %arg1: memref<2x4x8x256xbf16, #tpu.memory_space<vmem>>, %arg2: memref<4x8x256xbf16, #tpu.memory_space<vmem>>, %arg3: memref<16x32xf32, #tpu.memory_space<vmem>>, %arg4: memref<16x1xf32, #tpu.memory_space<vmem>>, %arg5: memref<2x8x256xf32, #tpu.memory_space<vmem>>, %arg6: memref<32x256xf32, #tpu.memory_space<vmem>>) attributes {dimension_semantics = [#tpu.dimension_semantics<parallel>], iteration_bounds = array<i64: 4>, scalar_prefetch = 0 : i64, scratch_operands = 1 : i64, tpu.core_type = #tpu.core_type<tc>, window_params = [{transform_indices = @transform_0, window_bounds = array<i64: 2, 4, 8, 256>}, {transform_indices = @transform_1, window_bounds = array<i64: 4, 8, 256>}, {pipeline_mode = #tpu.pipeline_mode<synchronous>, transform_indices = @transform_2, window_bounds = array<i64: 16, 32>}, {pipeline_mode = #tpu.pipeline_mode<synchronous>, transform_indices = @transform_3, window_bounds = array<i64: 16, 1>}, {transform_indices = @transform_4, window_bounds = array<i64: 2, 8, 256>}]} {
    %c0 = arith.constant 0 : index
    %c0_0 = arith.constant 0 : index
    %c0_1 = arith.constant 0 : index
    %c0_2 = arith.constant 0 : index
    %0 = vector.load %arg1[%c0, %c0_0, %c0_1, %c0_2] : memref<2x4x8x256xbf16, #tpu.memory_space<vmem>>, vector<1x4x8x256xbf16>
    %1 = vector.shape_cast %0 : vector<1x4x8x256xbf16> to vector<4x8x256xbf16>
    %2 = arith.extf %1 : vector<4x8x256xbf16> to vector<4x8x256xf32>
    %c0_3 = arith.constant 0 : index
    %c0_4 = arith.constant 0 : index
    %c0_5 = arith.constant 0 : index
    %3 = vector.load %arg2[%c0_3, %c0_4, %c0_5] : memref<4x8x256xbf16, #tpu.memory_space<vmem>>, vector<1x8x256xbf16>
    %4 = vector.shape_cast %3 : vector<1x8x256xbf16> to vector<8x256xbf16>
    %5 = arith.extf %4 : vector<8x256xbf16> to vector<8x256xf32>
    %6 = vector.shape_cast %5 : vector<8x256xf32> to vector<1x8x256xf32>
    %7 = vector.broadcast %6 : vector<1x8x256xf32> to vector<4x8x256xf32>
    %8 = arith.mulf %2, %7 : vector<4x8x256xf32>
    %cst = arith.constant dense<0.000000e+00> : vector<4x256xf32>
    %9 = vector.multi_reduction <add>, %8, %cst [1] : vector<4x8x256xf32> to vector<4x256xf32>
    %c0_6 = arith.constant 0 : index
    %c0_7 = arith.constant 0 : index
    %10 = vector.load %arg6[%c0_6, %c0_7] : memref<32x256xf32, #tpu.memory_space<vmem>>, vector<4x256xf32>
    tpu.vector_store %arg6[%c0_6, %c0_7], %9 {strides = array<i32>} : memref<32x256xf32, #tpu.memory_space<vmem>>, vector<4x256xf32>,
    %c0_8 = arith.constant 0 : index
    %c0_9 = arith.constant 0 : index
    %c0_10 = arith.constant 0 : index
    %c0_11 = arith.constant 0 : index
    %11 = vector.load %arg1[%c0_8, %c0_9, %c0_10, %c0_11] : memref<2x4x8x256xbf16, #tpu.memory_space<vmem>>, vector<1x4x8x256xbf16>
    %12 = vector.shape_cast %11 : vector<1x4x8x256xbf16> to vector<4x8x256xbf16>
    %13 = arith.extf %12 : vector<4x8x256xbf16> to vector<4x8x256xf32>
    %c1 = arith.constant 1 : index
    %c0_12 = arith.constant 0 : index
    %c0_13 = arith.constant 0 : index
    %14 = vector.load %arg2[%c1, %c0_12, %c0_13] : memref<4x8x256xbf16, #tpu.memory_space<vmem>>, vector<1x8x256xbf16>
    %15 = vector.shape_cast %14 : vector<1x8x256xbf16> to vector<8x256xbf16>
    %16 = arith.extf %15 : vector<8x256xbf16> to vector<8x256xf32>
    %17 = vector.shape_cast %16 : vector<8x256xf32> to vector<1x8x256xf32>
    %18 = vector.broadcast %17 : vector<1x8x256xf32> to vector<4x8x256xf32>
    %19 = arith.mulf %13, %18 : vector<4x8x256xf32>
    %cst_14 = arith.constant dense<0.000000e+00> : vector<4x256xf32>
    %20 = vector.multi_reduction <add>, %19, %cst_14 [1] : vector<4x8x256xf32> to vector<4x256xf32>
    %c4 = arith.constant 4 : index
    %c0_15 = arith.constant 0 : index
    %21 = vector.load %arg6[%c4, %c0_15] : memref<32x256xf32, #tpu.memory_space<vmem>>, vector<4x256xf32>
    tpu.vector_store %arg6[%c4, %c0_15], %20 {strides = array<i32>} : memref<32x256xf32, #tpu.memory_space<vmem>>, vector<4x256xf32>,
    %c0_16 = arith.constant 0 : index
    %c0_17 = arith.constant 0 : index
    %c0_18 = arith.constant 0 : index
    %c0_19 = arith.constant 0 : index
    %22 = vector.load %arg1[%c0_16, %c0_17, %c0_18, %c0_19] : memref<2x4x8x256xbf16, #tpu.memory_space<vmem>>, vector<1x4x8x256xbf16>
    %23 = vector.shape_cast %22 : vector<1x4x8x256xbf16> to vector<4x8x256xbf16>
    %24 = arith.extf %23 : vector<4x8x256xbf16> to vector<4x8x256xf32>
    %c2 = arith.constant 2 : index
    %c0_20 = arith.constant 0 : index
    %c0_21 = arith.constant 0 : index
    %25 = vector.load %arg2[%c2, %c0_20, %c0_21] : memref<4x8x256xbf16, #tpu.memory_space<vmem>>, vector<1x8x256xbf16>
    %26 = vector.shape_cast %25 : vector<1x8x256xbf16> to vector<8x256xbf16>
    %27 = arith.extf %26 : vector<8x256xbf16> to vector<8x256xf32>
    %28 = vector.shape_cast %27 : vector<8x256xf32> to vector<1x8x256xf32>
    %29 = vector.broadcast %28 : vector<1x8x256xf32> to vector<4x8x256xf32>
    %30 = arith.mulf %24, %29 : vector<4x8x256xf32>
    %cst_22 = arith.constant dense<0.000000e+00> : vector<4x256xf32>
    %31 = vector.multi_reduction <add>, %30, %cst_22 [1] : vector<4x8x256xf32> to vector<4x256xf32>
    %c8 = arith.constant 8 : index
    %c0_23 = arith.constant 0 : index
    %32 = vector.load %arg6[%c8, %c0_23] : memref<32x256xf32, #tpu.memory_space<vmem>>, vector<4x256xf32>
    tpu.vector_store %arg6[%c8, %c0_23], %31 {strides = array<i32>} : memref<32x256xf32, #tpu.memory_space<vmem>>, vector<4x256xf32>,
    %c0_24 = arith.constant 0 : index
    %c0_25 = arith.constant 0 : index
    %c0_26 = arith.constant 0 : index
    %c0_27 = arith.constant 0 : index
    %33 = vector.load %arg1[%c0_24, %c0_25, %c0_26, %c0_27] : memref<2x4x8x256xbf16, #tpu.memory_space<vmem>>, vector<1x4x8x256xbf16>
    %34 = vector.shape_cast %33 : vector<1x4x8x256xbf16> to vector<4x8x256xbf16>
    %35 = arith.extf %34 : vector<4x8x256xbf16> to vector<4x8x256xf32>
    %c3 = arith.constant 3 : index
    %c0_28 = arith.constant 0 : index
    %c0_29 = arith.constant 0 : index
    %36 = vector.load %arg2[%c3, %c0_28, %c0_29] : memref<4x8x256xbf16, #tpu.memory_space<vmem>>, vector<1x8x256xbf16>
    %37 = vector.shape_cast %36 : vector<1x8x256xbf16> to vector<8x256xbf16>
    %38 = arith.extf %37 : vector<8x256xbf16> to vector<8x256xf32>
    %39 = vector.shape_cast %38 : vector<8x256xf32> to vector<1x8x256xf32>
    %40 = vector.broadcast %39 : vector<1x8x256xf32> to vector<4x8x256xf32>
    %41 = arith.mulf %35, %40 : vector<4x8x256xf32>
    %cst_30 = arith.constant dense<0.000000e+00> : vector<4x256xf32>
    %42 = vector.multi_reduction <add>, %41, %cst_30 [1] : vector<4x8x256xf32> to vector<4x256xf32>
    %c12 = arith.constant 12 : index
    %c0_31 = arith.constant 0 : index
    %43 = vector.load %arg6[%c12, %c0_31] : memref<32x256xf32, #tpu.memory_space<vmem>>, vector<4x256xf32>
    tpu.vector_store %arg6[%c12, %c0_31], %42 {strides = array<i32>} : memref<32x256xf32, #tpu.memory_space<vmem>>, vector<4x256xf32>,
    %c1_32 = arith.constant 1 : index
    %c0_33 = arith.constant 0 : index
    %c0_34 = arith.constant 0 : index
    %c0_35 = arith.constant 0 : index
    %44 = vector.load %arg1[%c1_32, %c0_33, %c0_34, %c0_35] : memref<2x4x8x256xbf16, #tpu.memory_space<vmem>>, vector<1x4x8x256xbf16>
    %45 = vector.shape_cast %44 : vector<1x4x8x256xbf16> to vector<4x8x256xbf16>
    %46 = arith.extf %45 : vector<4x8x256xbf16> to vector<4x8x256xf32>
    %c0_36 = arith.constant 0 : index
    %c0_37 = arith.constant 0 : index
    %c0_38 = arith.constant 0 : index
    %47 = vector.load %arg2[%c0_36, %c0_37, %c0_38] : memref<4x8x256xbf16, #tpu.memory_space<vmem>>, vector<1x8x256xbf16>
    %48 = vector.shape_cast %47 : vector<1x8x256xbf16> to vector<8x256xbf16>
    %49 = arith.extf %48 : vector<8x256xbf16> to vector<8x256xf32>
    %50 = vector.shape_cast %49 : vector<8x256xf32> to vector<1x8x256xf32>
    %51 = vector.broadcast %50 : vector<1x8x256xf32> to vector<4x8x256xf32>
    %52 = arith.mulf %46, %51 : vector<4x8x256xf32>
    %cst_39 = arith.constant dense<0.000000e+00> : vector<4x256xf32>
    %53 = vector.multi_reduction <add>, %52, %cst_39 [1] : vector<4x8x256xf32> to vector<4x256xf32>
    %c16 = arith.constant 16 : index
    %c0_40 = arith.constant 0 : index
    %54 = vector.load %arg6[%c16, %c0_40] : memref<32x256xf32, #tpu.memory_space<vmem>>, vector<4x256xf32>
    tpu.vector_store %arg6[%c16, %c0_40], %53 {strides = array<i32>} : memref<32x256xf32, #tpu.memory_space<vmem>>, vector<4x256xf32>,
    %c1_41 = arith.constant 1 : index
    %c0_42 = arith.constant 0 : index
    %c0_43 = arith.constant 0 : index
    %c0_44 = arith.constant 0 : index
    %55 = vector.load %arg1[%c1_41, %c0_42, %c0_43, %c0_44] : memref<2x4x8x256xbf16, #tpu.memory_space<vmem>>, vector<1x4x8x256xbf16>
    %56 = vector.shape_cast %55 : vector<1x4x8x256xbf16> to vector<4x8x256xbf16>
    %57 = arith.extf %56 : vector<4x8x256xbf16> to vector<4x8x256xf32>
    %c1_45 = arith.constant 1 : index
    %c0_46 = arith.constant 0 : index
    %c0_47 = arith.constant 0 : index
    %58 = vector.load %arg2[%c1_45, %c0_46, %c0_47] : memref<4x8x256xbf16, #tpu.memory_space<vmem>>, vector<1x8x256xbf16>
    %59 = vector.shape_cast %58 : vector<1x8x256xbf16> to vector<8x256xbf16>
    %60 = arith.extf %59 : vector<8x256xbf16> to vector<8x256xf32>
    %61 = vector.shape_cast %60 : vector<8x256xf32> to vector<1x8x256xf32>
    %62 = vector.broadcast %61 : vector<1x8x256xf32> to vector<4x8x256xf32>
    %63 = arith.mulf %57, %62 : vector<4x8x256xf32>
    %cst_48 = arith.constant dense<0.000000e+00> : vector<4x256xf32>
    %64 = vector.multi_reduction <add>, %63, %cst_48 [1] : vector<4x8x256xf32> to vector<4x256xf32>
    %c20 = arith.constant 20 : index
    %c0_49 = arith.constant 0 : index
    %65 = vector.load %arg6[%c20, %c0_49] : memref<32x256xf32, #tpu.memory_space<vmem>>, vector<4x256xf32>
    tpu.vector_store %arg6[%c20, %c0_49], %64 {strides = array<i32>} : memref<32x256xf32, #tpu.memory_space<vmem>>, vector<4x256xf32>,
    %c1_50 = arith.constant 1 : index
    %c0_51 = arith.constant 0 : index
    %c0_52 = arith.constant 0 : index
    %c0_53 = arith.constant 0 : index
    %66 = vector.load %arg1[%c1_50, %c0_51, %c0_52, %c0_53] : memref<2x4x8x256xbf16, #tpu.memory_space<vmem>>, vector<1x4x8x256xbf16>
    %67 = vector.shape_cast %66 : vector<1x4x8x256xbf16> to vector<4x8x256xbf16>
    %68 = arith.extf %67 : vector<4x8x256xbf16> to vector<4x8x256xf32>
    %c2_54 = arith.constant 2 : index
    %c0_55 = arith.constant 0 : index
    %c0_56 = arith.constant 0 : index
    %69 = vector.load %arg2[%c2_54, %c0_55, %c0_56] : memref<4x8x256xbf16, #tpu.memory_space<vmem>>, vector<1x8x256xbf16>
    %70 = vector.shape_cast %69 : vector<1x8x256xbf16> to vector<8x256xbf16>
    %71 = arith.extf %70 : vector<8x256xbf16> to vector<8x256xf32>
    %72 = vector.shape_cast %71 : vector<8x256xf32> to vector<1x8x256xf32>
    %73 = vector.broadcast %72 : vector<1x8x256xf32> to vector<4x8x256xf32>
    %74 = arith.mulf %68, %73 : vector<4x8x256xf32>
    %cst_57 = arith.constant dense<0.000000e+00> : vector<4x256xf32>
    %75 = vector.multi_reduction <add>, %74, %cst_57 [1] : vector<4x8x256xf32> to vector<4x256xf32>
    %c24 = arith.constant 24 : index
    %c0_58 = arith.constant 0 : index
    %76 = vector.load %arg6[%c24, %c0_58] : memref<32x256xf32, #tpu.memory_space<vmem>>, vector<4x256xf32>
    tpu.vector_store %arg6[%c24, %c0_58], %75 {strides = array<i32>} : memref<32x256xf32, #tpu.memory_space<vmem>>, vector<4x256xf32>,
    %c1_59 = arith.constant 1 : index
    %c0_60 = arith.constant 0 : index
    %c0_61 = arith.constant 0 : index
    %c0_62 = arith.constant 0 : index
    %77 = vector.load %arg1[%c1_59, %c0_60, %c0_61, %c0_62] : memref<2x4x8x256xbf16, #tpu.memory_space<vmem>>, vector<1x4x8x256xbf16>
    %78 = vector.shape_cast %77 : vector<1x4x8x256xbf16> to vector<4x8x256xbf16>
    %79 = arith.extf %78 : vector<4x8x256xbf16> to vector<4x8x256xf32>
    %c3_63 = arith.constant 3 : index
    %c0_64 = arith.constant 0 : index
    %c0_65 = arith.constant 0 : index
    %80 = vector.load %arg2[%c3_63, %c0_64, %c0_65] : memref<4x8x256xbf16, #tpu.memory_space<vmem>>, vector<1x8x256xbf16>
    %81 = vector.shape_cast %80 : vector<1x8x256xbf16> to vector<8x256xbf16>
    %82 = arith.extf %81 : vector<8x256xbf16> to vector<8x256xf32>
    %83 = vector.shape_cast %82 : vector<8x256xf32> to vector<1x8x256xf32>
    %84 = vector.broadcast %83 : vector<1x8x256xf32> to vector<4x8x256xf32>
    %85 = arith.mulf %79, %84 : vector<4x8x256xf32>
    %cst_66 = arith.constant dense<0.000000e+00> : vector<4x256xf32>
    %86 = vector.multi_reduction <add>, %85, %cst_66 [1] : vector<4x8x256xf32> to vector<4x256xf32>
    %c28 = arith.constant 28 : index
    %c0_67 = arith.constant 0 : index
    %87 = vector.load %arg6[%c28, %c0_67] : memref<32x256xf32, #tpu.memory_space<vmem>>, vector<4x256xf32>
    tpu.vector_store %arg6[%c28, %c0_67], %86 {strides = array<i32>} : memref<32x256xf32, #tpu.memory_space<vmem>>, vector<4x256xf32>,
    %c0_68 = arith.constant 0 : index
    %c0_69 = arith.constant 0 : index
    %88 = vector.load %arg3[%c0_68, %c0_69] : memref<16x32xf32, #tpu.memory_space<vmem>>, vector<16x32xf32>
    %c0_70 = arith.constant 0 : index
    %c0_71 = arith.constant 0 : index
    %89 = vector.load %arg6[%c0_70, %c0_71] : memref<32x256xf32, #tpu.memory_space<vmem>>, vector<32x256xf32>
    %cst_72 = arith.constant dense<0.000000e+00> : vector<16x256xf32>
    %90 = tpu.matmul %88, %89, %cst_72 {dimension_numbers = #tpu.dot_dimension_numbers<[1], [0], [0], [1], [0, 0, 1, 1], [], []>} : vector<16x32xf32>, vector<32x256xf32>, vector<16x256xf32> -> vector<16x256xf32>
    %c0_73 = arith.constant 0 : index
    %c0_74 = arith.constant 0 : index
    %91 = vector.load %arg4[%c0_73, %c0_74] : memref<16x1xf32, #tpu.memory_space<vmem>>, vector<16x1xf32>
    %92 = vector.broadcast %91 : vector<16x1xf32> to vector<16x256xf32>
    %93 = arith.addf %90, %92 : vector<16x256xf32>
    %94 = vector.shape_cast %93 : vector<16x256xf32> to vector<2x8x256xf32>
    %c0_75 = arith.constant 0 : index
    %c0_76 = arith.constant 0 : index
    %c0_77 = arith.constant 0 : index
    %95 = vector.load %arg5[%c0_75, %c0_76, %c0_77] : memref<2x8x256xf32, #tpu.memory_space<vmem>>, vector<2x8x256xf32>
    tpu.vector_store %arg5[%c0_75, %c0_76, %c0_77], %94 {strides = array<i32>} : memref<2x8x256xf32, #tpu.memory_space<vmem>>, vector<2x8x256xf32>,
    return
  }
  func.func @transform_0(%arg0: i32) -> (i32, i32, i32, i32) {
    %c0_i32 = arith.constant 0 : i32
    %c0_i32_0 = arith.constant 0 : i32
    %c0_i32_1 = arith.constant 0 : i32
    %c0_i32_2 = arith.constant 0 : i32
    return %c0_i32, %c0_i32_0, %c0_i32_1, %arg0 : i32, i32, i32, i32
  }
  func.func @transform_1(%arg0: i32) -> (i32, i32, i32) {
    %c0_i32 = arith.constant 0 : i32
    %c0_i32_0 = arith.constant 0 : i32
    %c0_i32_1 = arith.constant 0 : i32
    return %c0_i32, %c0_i32_0, %arg0 : i32, i32, i32
  }
  func.func @transform_2(%arg0: i32) -> (i32, i32) {
    %c0_i32 = arith.constant 0 : i32
    %c0_i32_0 = arith.constant 0 : i32
    %c0_i32_1 = arith.constant 0 : i32
    return %c0_i32, %c0_i32_0 : i32, i32
  }
  func.func @transform_3(%arg0: i32) -> (i32, i32) {
    %c0_i32 = arith.constant 0 : i32
    %c0_i32_0 = arith.constant 0 : i32
    %c0_i32_1 = arith.constant 0 : i32
    return %c0_i32, %c0_i32_0 : i32, i32
  }
  func.func @transform_4(%arg0: i32) -> (i32, i32, i32) {
    %c0_i32 = arith.constant 0 : i32
    %c0_i32_0 = arith.constant 0 : i32
    %c0_i32_1 = arith.constant 0 : i32
    return %c0_i32, %c0_i32_0, %arg0 : i32, i32, i32
  }
}

</mosaic_0001>

<bundles_post_ra>
// kernel: tpu_custom_call.1
= control target key start
LH: loop header
LB: loop body
LE: loop exit
PB: predicated region body
PF: predicated region fallthrough
CT: control target
= control target key end

     0   :  { %9 = vsyncpa [#allocation4], 0  ;;  %s1989_s0 = inlined_call_operand.hbm [shape: bf16[2,4,8,1024], index: 0, kind: input, shape index: {}]   ;;  %s1990_s1 = inlined_call_operand.hbm [shape: bf16[4,8,1024], index: 1, kind: input, shape index: {}]   ;;  %s1991_s2 = inlined_call_operand.vmem [shape: f32[16,32], index: 2, kind: input, shape index: {}]   ;;  %s1992_s3 = inlined_call_operand.vmem [shape: f32[16,1], index: 3, kind: input, shape index: {}]   ;;  %s1993_s4 = inlined_call_operand.hbm [shape: f32[2,8,1024], index: 4, kind: output, shape index: {}]  }
   0x1   :  { %11 = vsyncpa [#allocation4 + $0x1], 0 }
   0x2   :  { %12 = vsyncpa [#allocation7], 0 }
   0x3   :  { %14 = vsyncpa [#allocation7 + $0x1], 0 }
   0x4   :  { %15 = vsyncpa [#allocation5], 0 }
   0x5   :  { %17 = vsyncpa [#allocation5 + $0x1], 0  ;;  %s1486_s15 = smov 0   ;;  %s1488_s16 = smov 0  }
   0x6   :  { %s1490_s17 = smov 0   ;;  %s1492_s18 = smov 0  }
   0x7 LB: > { %s1507_s19 = sadd.s32 4294967295, %s1448_s18   ;;  %s1201_s20 = sadd.s32 4294967294, %s1448_s18   ;;  %s1448_s18 = sphi %s1492_s18, %s2011_s18   ;;  %s1444_s17 = sphi %s1490_s17, %s2010_s17   ;;  %s1440_s16 = sphi %s1488_s16, %s2009_s16   ;;  %s1436_s15 = sphi %s1486_s15, %s2008_s15  }
   0x8   : > { %s1511_s21 = sadd.s32 1, %s1448_s18   ;;  %s30_s22 = sadd.s32 1, %s1444_s17 }
   0x9   : > { %s27_s23 = ssub.s32 %s1448_s18, %s1511_s21  ;;  %p37_p0 = scmp.ne.s32.totalorder %s1444_s17, %s1440_s16 }
   0xa   : > { %p28_p1 = scmp.eq.s32.totalorder %s27_s23, 0  ;;  %p38_p2 = scmp.eq.s32.totalorder %s1448_s18, 0 }
   0xb   : > { %p43_p3 = scmp.ne.s32.totalorder %s1440_s16, %s1436_s15  ;;  %p44_p4 = scmp.eq.s32.totalorder %s1507_s19, 0 }
   0xc   : > { %s1523_s24 = scalar_select %p28_p1, %s1444_s17, %s30_s22  }
   0xd   : > { %p1525_p5 = por %p38_p2, %p37_p0  ;;  %p1529_p6 = por %p44_p4, %p43_p3 }
   0xe   : > { %p135_p7 = scmp.eq.s32.totalorder %s1507_s19, 3  ;;  %p141_p8 = scmp.eq.s32.totalorder %s1201_s20, 3 }
   0xf   : > { %s1998_s26 = scalar_select %p1529_p6, 1, 0 }
  0x10   : > { %p1275_p9 = scmp.lt.s32.totalorder %s1448_s18, 4  ;;  %p1535_p10 = por %p135_p7, %p37_p0 }
  0x11   : > { %p1539_p11 = por %p141_p8, %p43_p3  ;;  %s1544_s29 = sand.u32 1, %s1444_s17  }
  0x12   : > { %s1999_s27 = scalar_select %p1535_p10, 1, 0 }
  0x13   : > { %s2000_s28 = scalar_select %p1539_p11, 1, 0 }
  0x14   : > { %s1243_s30 = sshll.u32 %s1448_s18, 7  ;;  %s1204_s5 = sshll.u32 %s1544_s29, 6 }
  0x15   : > { %s1553_s8 = scalar_lea.hbm %s1989_s0, %s1243_s30  ;;  %s171_s9 = scalar_lea.vmem [#allocation3], %s1204_s5 }
  0x16   : > { %s178_s10 = sshll.u32 %s171_s9, 4  ;;  %p1557_p12 = pnand %p1275_p9, %p1525_p5  ;;  %s1561_s10 = int_to_ptr.vmem [resolvable:$true] %s178_s10 }
  0x17   : > { %s168_s12 = scalar_lea.sflag [#allocation4], %s1544_s29  ;;  %s1318_s13 = scalar_lea.hbm %s1553_s8, 1024 }
  0x18   : > { %p1319_p0 = scmp.ne.s32.totalorder %s1553_s8, %s1318_s13  ;;  %p1320_p1 = pneg %p1557_p12 }
  0x19   : > { %s1323_s22 = scalar_lea.hbm %s1989_s0, 4096  ;;  %p1324_p4 = scmp.lt.u32.totalorder %s1553_s8, %s1989_s0 }
  0x1a   : > { %p1321_p2 = pnand %p1320_p1, %p1319_p0  ;;  %p1325_p5 = scmp.lt.u32.totalorder %s1323_s22, %s1318_s13 }
  0x1b   : > { %p1327_p8 = scmp.lt.u32.totalorder %s1318_s13, %s1553_s8 }
  0x1c   : > { %p1322_p3 = pneg %p1321_p2  ;;  %p1326_p7 = por %p1325_p5, %p1324_p4 }
  0x1e   : > { %p1328_p9 = por %p1327_p8, %p1326_p7 }
  0x20   : > { %p1329_p13 = pnand %p1328_p9, %p1322_p3 }
  0x22   : > { %1332 = shalt.err (!%p1329_p13)
}
  0x23   : > { %s1333_s5 = scalar_lea.vmem %s1561_s10, 1024  ;;  %s1450_s6 = smov [#allocation3]  }
  0x24   : > { %p1334_p0 = scmp.ne.s32.totalorder %s1561_s10, %s1333_s5  ;;  %s1338_s7 = sshll.u32 %s1450_s6, 4  ;;  %s1339_s7 = int_to_ptr.vmem [resolvable:$false] %s1338_s7 }
  0x25   : > { %s1340_s9 = scalar_lea.vmem %s1339_s7, 2048  ;;  %p1341_p10 = scmp.lt.s32.totalorder %s1561_s10, %s1339_s7 }
  0x26   : > { %p1336_p2 = pnand %p1334_p0, %p1320_p1  ;;  %p1342_p4 = scmp.lt.s32.totalorder %s1340_s9, %s1333_s5 }
  0x28   : > { %p1337_p11 = pneg %p1336_p2  ;;  %p1343_p5 = por %p1342_p4, %p1341_p10 }
  0x2a   : > { %p1344_p7 = pnand %p1343_p5, %p1337_p11 }
  0x2c   : > { %1347 = shalt.err (!%p1344_p7)
}
  0x2d   : > { %s1995_s13 = smov 512   ;;  %s1452_s14 = smov 128  }
  0x2e   : > { %s1453_s20 = smov 8   ;;  %p207_p10 = scmp.lt.s32.totalorder %s1448_s18, 5 }
  0x2f   : > { %1267 = dma.hbm_to_vmem [thread:$0]  (!%p1557_p12), %s1553_s8, 1024, %s1561_s10, %s168_s12, %s1995_s13, %s1452_s14, %s1453_s20  }
  0x30   : > { %s1207_s22 = sshll.u32 %s1544_s29, 5  ;;  %s1602_s5 = scalar_lea.hbm %s1990_s1, %s1243_s30 }
  0x31   : > { %p2002_p11 = scmp.ge.s32.totalorder %s1448_s18, 1  ;;  %s192_s7 = scalar_lea.vmem [#allocation6], %s1207_s22 }
  0x32   : > { %s199_s9 = sshll.u32 %s192_s7, 4  ;;  %s189_s8 = scalar_lea.sflag [#allocation7], %s1544_s29  ;;  %s1610_s9 = int_to_ptr.vmem [resolvable:$true] %s199_s9 }
  0x33   : > { %p1606_p13 = pnand %p2002_p11, %p207_p10  ;;  %s1348_s10 = scalar_lea.hbm %s1602_s5, 512 }
  0x34   : > { %p1349_p3 = scmp.ne.s32.totalorder %s1602_s5, %s1348_s10  ;;  %s1353_s23 = scalar_lea.hbm %s1990_s1, 2048 }
  0x35   : > { %p1354_p0 = scmp.lt.u32.totalorder %s1602_s5, %s1990_s1  ;;  %p1355_p2 = scmp.lt.u32.totalorder %s1353_s23, %s1348_s10 }
  0x36   : > { %p1351_p8 = pnand %p1349_p3, %p1320_p1  ;;  %p1357_p5 = scmp.lt.u32.totalorder %s1348_s10, %s1602_s5 }
  0x37   : > { %p1356_p4 = por %p1355_p2, %p1354_p0 }
  0x38   : > { %p1352_p9 = pneg %p1351_p8 }
  0x39   : > { %p1358_p7 = por %p1357_p5, %p1356_p4 }
  0x3b   : > { %p1359_p10 = pnand %p1358_p7, %p1352_p9 }
  0x3d   : > { %1362 = shalt.err (!%p1359_p10)
}
  0x3e   : > { %s1363_s22 = scalar_lea.vmem %s1610_s9, 512  ;;  %s1454_s7 = smov [#allocation6]  }
  0x3f   : > { %p1364_p11 = scmp.ne.s32.totalorder %s1610_s9, %s1363_s22  ;;  %s1368_s30 = sshll.u32 %s1454_s7, 4  ;;  %s1369_s30 = int_to_ptr.vmem [resolvable:$false] %s1368_s30 }
  0x40   : > { %s1370_s13 = scalar_lea.vmem %s1369_s30, 1024  ;;  %p1371_p6 = scmp.lt.s32.totalorder %s1610_s9, %s1369_s30 }
  0x41   : > { %p1366_p3 = pnand %p1364_p11, %p1320_p1  ;;  %p1372_p0 = scmp.lt.s32.totalorder %s1370_s13, %s1363_s22 }
  0x43   : > { %p1367_p8 = pneg %p1366_p3  ;;  %p1373_p2 = por %p1372_p0, %p1371_p6 }
  0x45   : > { %p1374_p4 = pnand %p1373_p2, %p1367_p8 }
  0x47   : > { %1377 = shalt.err (!%p1374_p4)
}
  0x48   : > { %s2004_s10 = smov 512   ;;  %211 = sbr.rel (%p1606_p13) target bundleno = 464 (0x1d0), region = 36 }
  0x49   : > { %1270 = dma.hbm_to_vmem [thread:$0]  (!%p1557_p12), %s1602_s5, 512, %s1610_s9, %s189_s8, %s2004_s10, %s1452_s14, %s1453_s20  }
  0x4a   : > { %s1644_s12 = sand.u32 (!%p1606_p13), 1, %s1440_s16   ;;  %p2005_p6 = scmp.ne.s32.totalorder (!%p1606_p13), %s1998_s26, 0 }
  0x4b   : > { %s1211_s23 = sshll.u32 (!%p1606_p13), %s1644_s12, 6  ;;  %s214_s25 = scalar_lea.sflag (!%p1606_p13), [#allocation4], %s1644_s12 }
  0x4c   : > { %s1648_s11 = scalar_lea.vmem (!%p1606_p13), [#allocation3], %s1211_s23 }
  0x4f   : > { %1423 = dma.done.wait (%p2005_p6), %s214_s25, 1024  }
  0x50   : > { %1425 = vsyncadd (%p2005_p6), %s214_s25, 4294966272  ;;  %s1212_s29 = sshll.u32 %s1644_s12, 5  ;;  %s223_s14 = scalar_lea.sflag [#allocation7], %s1644_s12 }
  0x51   : > { %s226_s20 = scalar_lea.vmem [#allocation6], %s1212_s29 }
  0x52   : > { %1427 = dma.done.wait (%p2005_p6), %s223_s14, 512  }
  0x53   : > { %1429 = vsyncadd (%p2005_p6), %s223_s14, 4294966784  ;;  %v259_v0 = vld [vmem:[%s1648_s11] sm:$0xff]  ;;  %v260_v1 = vld [vmem:[%s1648_s11 + $0x8] sm:$0xff]  ;;  %vm338_vm0 = vcmask 1041409   ;;  %vm340_vm1 = vcmask 1042434   ;;  %vm431_vm2 = vcmask 1045509  }
  0x54   : > { %v261_v2 = vld [vmem:[%s1648_s11 + $0x10] sm:$0xff]  ;;  %v262_v3 = vld [vmem:[%s1648_s11 + $0x18] sm:$0xff]  ;;  %v1666_v4 = vunpack.c.h.bf16 %v259_v0  ;;  %v1668_v5 = vunpack.c.h.bf16 %v260_v1  ;;  %v1672_v7 = vld [vmem:[%s226_s20] sm:$0xff]  ;;  %v1676_v9 = vunpack.c.l.bf16 %v259_v0  ;;  %v1690_v15 = vunpack.c.l.bf16 %v260_v1  ;;  %s255_s13 = scalar_lea.vmem [#allocation8], %s1212_s29  ;;  %s1245_s23 = sshll.u32 %s1507_s19, 8 }
  0x55   : > { %v1670_v6 = vunpack.c.h.bf16 %v261_v2  ;;  %v1674_v8 = vld [vmem:[%s226_s20 + $0x8] sm:$0xff]  ;;  %v1678_v10 = vunpack.c.h.bf16 %v262_v3  ;;  %v1681_v11 = vunpack.c.h.bf16 %v1672_v7  ;;  %v1686_v13 = vld [vmem:[%s226_s20 + $0x10] sm:$0xff]  ;;  %v1688_v14 = vld [vmem:[%s226_s20 + $0x18] sm:$0xff]  ;;  %v1698_v18 = vunpack.c.l.bf16 %v261_v2  ;;  %s1105_s10 = sshll.u32 %s255_s13, 4  ;;  %s1946_s14 = scalar_lea.hbm %s1993_s4, %s1245_s23  ;;  %s1941_s10 = int_to_ptr.vmem [resolvable:$true] %s1105_s10 }
  0x56   : > { %v1684_v12 = vunpack.c.h.bf16 %v1674_v8  ;;  %v1693_v16 = vunpack.c.h.bf16 %v1686_v13  ;;  %v1696_v17 = vunpack.c.h.bf16 %v1688_v14  ;;  %v1700_v19 = vunpack.c.l.bf16 %v262_v3  ;;  %s1092_s19 = scalar_lea.sflag [#allocation5], %s1644_s12  ;;  %s1378_s29 = scalar_lea.vmem %s1941_s10, 512 }
  0x57   : > { %v275_v20 = vmul.f32 %v1681_v11, %v1666_v4  ;;  %v277_v21 = vmul.f32 %v1681_v11, %v1668_v5  ;;  %v279_v22 = vmul.f32 %v1681_v11, %v1670_v6  ;;  %v281_v23 = vmul.f32 %v1681_v11, %v1678_v10  ;;  %p1379_p12 = scmp.ne.s32.totalorder %s1941_s10, %s1378_s29  ;;  %p2006_p1 = scmp.ne.s32.totalorder %s1999_s27, 0 }
  0x58   : > { %v368_v24 = vmul.f32 %v1684_v12, %v1666_v4  ;;  %v370_v25 = vmul.f32 %v1684_v12, %v1668_v5  ;;  %v372_v26 = vmul.f32 %v1684_v12, %v1670_v6  ;;  %v374_v27 = vmul.f32 %v1684_v12, %v1678_v10  ;;  %s1457_s20 = smov [#allocation8]  }
  0x59   : > { %v288_v28 = vrot.slane %v275_v20, 4  ;;  %v300_v29 = vrot.slane %v277_v21, 4  ;;  %v312_v30 = vrot.slane %v279_v22, 4  ;;  %v324_v31 = vrot.slane %v281_v23, 4  ;;  %p1380_p13 = pnand %p1379_p12, %p2006_p1  ;;  %s1382_s26 = sshll.u32 %s1457_s20, 4  ;;  %s1383_s26 = int_to_ptr.vmem [resolvable:$false] %s1382_s26 }
  0x5a   : > { %v381_v32 = vrot.slane %v368_v24, 4  ;;  %v393_v33 = vrot.slane %v370_v25, 4  ;;  %v405_v34 = vrot.slane %v372_v26, 4  ;;  %v417_v35 = vrot.slane %v374_v27, 4  ;;  %s1384_s5 = scalar_lea.vmem %s1383_s26, 1024  ;;  %p1385_p5 = scmp.lt.s32.totalorder %s1941_s10, %s1383_s26 }
  0x5b   : > { %v289_v36 = vadd.f32 %v288_v28, %v275_v20  ;;  %v301_v37 = vadd.f32 %v300_v29, %v277_v21  ;;  %v313_v38 = vadd.f32 %v312_v30, %v279_v22  ;;  %v325_v39 = vadd.f32 %v324_v31, %v281_v23  ;;  %p1381_p9 = pneg %p1380_p13  ;;  %p1386_p7 = scmp.lt.s32.totalorder %s1384_s5, %s1378_s29 }
  0x5c   : > { %vm342_vm3 = vcmask 1043459   ;;  %v382_v40 = vadd.f32 %v381_v32, %v368_v24  ;;  %v394_v41 = vadd.f32 %v393_v33, %v370_v25  ;;  %v406_v42 = vadd.f32 %v405_v34, %v372_v26 }
  0x5d   : > { %v418_v43 = vadd.f32 %v417_v35, %v374_v27  ;;  %vm433_vm4 = vcmask 1046534   ;;  %v290_v44 = vrot.slane %v289_v36, 2  ;;  %v302_v45 = vrot.slane %v301_v37, 2  ;;  %p1387_p10 = por %p1386_p7, %p1385_p5 }
  0x5e   : > { %v314_v46 = vrot.slane %v313_v38, 2  ;;  %v326_v47 = vrot.slane %v325_v39, 2  ;;  %vm435_vm5 = vcmask 1047559   ;;  %v383_v48 = vrot.slane %v382_v40, 2 }
  0x5f   : > { %v395_v49 = vrot.slane %v394_v41, 2  ;;  %v407_v50 = vrot.slane %v406_v42, 2  ;;  %v419_v51 = vrot.slane %v418_v43, 2  ;;  %v291_v52 = vadd.f32 %v290_v44, %v289_v36  ;;  %p1388_p11 = pnand %p1387_p10, %p1381_p9 }
  0x60   : > { %v303_v53 = vadd.f32 %v302_v45, %v301_v37  ;;  %v315_v54 = vadd.f32 %v314_v46, %v313_v38  ;;  %v327_v55 = vadd.f32 %v326_v47, %v325_v39  ;;  %v384_v56 = vadd.f32 %v383_v48, %v382_v40 }
  0x61   : > { %v396_v57 = vadd.f32 %v395_v49, %v394_v41  ;;  %v408_v58 = vadd.f32 %v407_v50, %v406_v42  ;;  %v420_v59 = vadd.f32 %v419_v51, %v418_v43  ;;  %v292_v60 = vrot.slane %v291_v52, 1 }
  0x62   : > { %v304_v61 = vrot.slane %v303_v53, 1  ;;  %v316_v62 = vrot.slane %v315_v54, 1  ;;  %v328_v63 = vrot.slane %v327_v55, 1  ;;  %v385_v0 = vrot.slane %v384_v56, 1 }
  0x63   : > { %v397_v1 = vrot.slane %v396_v57, 1  ;;  %v409_v2 = vrot.slane %v408_v58, 1  ;;  %v421_v3 = vrot.slane %v420_v59, 1  ;;  %v293_v20 = vadd.f32 %v292_v60, %v291_v52 }
  0x64   : > { %v305_v21 = vadd.f32 %v304_v61, %v303_v53  ;;  %v317_v22 = vadd.f32 %v316_v62, %v315_v54  ;;  %v329_v23 = vadd.f32 %v328_v63, %v327_v55  ;;  %v386_v24 = vadd.f32 %v385_v0, %v384_v56 }
  0x65   : > { %v398_v25 = vadd.f32 %v397_v1, %v396_v57  ;;  %v410_v26 = vadd.f32 %v409_v2, %v408_v58  ;;  %v422_v27 = vadd.f32 %v421_v3, %v420_v59  ;;  %v461_v29 = vmul.f32 %v1693_v16, %v1666_v4 }
  0x66   : > { %v344_v28 = vsel %vm338_vm0, %v305_v21, %v293_v20  ;;  %v463_v30 = vmul.f32 %v1693_v16, %v1668_v5  ;;  %v465_v31 = vmul.f32 %v1693_v16, %v1670_v6  ;;  %v467_v34 = vmul.f32 %v1693_v16, %v1678_v10 }
  0x67   : > { %v345_v32 = vsel %vm340_vm1, %v317_v22, %v344_v28  ;;  %v437_v33 = vsel %vm431_vm2, %v398_v25, %v386_v24  ;;  %v551_v35 = vmul.f32 %v1696_v17, %v1666_v4  ;;  %v474_v38 = vrot.slane %v461_v29, 4 }
  0x68   : > { %v346_v36 = vsel %vm342_vm3, %v329_v23, %v345_v32  ;;  %v438_v37 = vsel %vm433_vm4, %v410_v26, %v437_v33  ;;  %v486_v39 = vrot.slane %v463_v30, 4  ;;  %v498_v41 = vrot.slane %v465_v31, 4 }
  0x69   : > { %350 = vst [vmem:[#allocation2 + $0x8] sm:$0xf] %v346_v36  ;;  %v439_v40 = vsel %vm435_vm5, %v422_v27, %v438_v37  ;;  %v510_v42 = vrot.slane %v467_v34, 4  ;;  %v553_v43 = vmul.f32 %v1696_v17, %v1668_v5  ;;  %v475_v44 = vadd.f32 %v474_v38, %v461_v29 }
  0x6a   : > { %443 = vst [vmem:[#allocation2 + $0x8] sm:$0xf0] %v439_v40  ;;  %v487_v45 = vadd.f32 %v486_v39, %v463_v30  ;;  %v555_v4 = vmul.f32 %v1696_v17, %v1670_v6  ;;  %v557_v46 = vmul.f32 %v1696_v17, %v1678_v10  ;;  %v499_v47 = vadd.f32 %v498_v41, %v465_v31 }
  0x6b   : > { %v511_v48 = vadd.f32 %v510_v42, %v467_v34  ;;  %v564_v49 = vrot.slane %v551_v35, 4  ;;  %v576_v50 = vrot.slane %v553_v43, 4  ;;  %v476_v51 = vrot.slane %v475_v44, 2 }
  0x6c   : > { %v488_v52 = vrot.slane %v487_v45, 2  ;;  %v588_v53 = vrot.slane %v555_v4, 4  ;;  %v600_v54 = vrot.slane %v557_v46, 4  ;;  %v500_v55 = vrot.slane %v499_v47, 2 }
  0x6d   : > { %v512_v56 = vrot.slane %v511_v48, 2  ;;  %v565_v5 = vadd.f32 %v564_v49, %v551_v35  ;;  %v577_v57 = vadd.f32 %v576_v50, %v553_v43  ;;  %v477_v58 = vadd.f32 %v476_v51, %v475_v44 }
  0x6e   : > { %v489_v59 = vadd.f32 %v488_v52, %v487_v45  ;;  %v589_v60 = vadd.f32 %v588_v53, %v555_v4  ;;  %v601_v61 = vadd.f32 %v600_v54, %v557_v46  ;;  %v501_v6 = vadd.f32 %v500_v55, %v499_v47 }
  0x6f   : > { %v513_v62 = vadd.f32 %v512_v56, %v511_v48  ;;  %v566_v63 = vrot.slane %v565_v5, 2  ;;  %v578_v10 = vrot.slane %v577_v57, 2  ;;  %v478_v0 = vrot.slane %v477_v58, 1 }
  0x70   : > { %v490_v1 = vrot.slane %v489_v59, 1  ;;  %v590_v2 = vrot.slane %v589_v60, 2  ;;  %v602_v3 = vrot.slane %v601_v61, 2  ;;  %v502_v20 = vrot.slane %v501_v6, 1 }
  0x71   : > { %v514_v21 = vrot.slane %v513_v62, 1  ;;  %v567_v22 = vadd.f32 %v566_v63, %v565_v5  ;;  %v579_v23 = vadd.f32 %v578_v10, %v577_v57  ;;  %v479_v24 = vadd.f32 %v478_v0, %v477_v58 }
  0x72   : > { %v491_v25 = vadd.f32 %v490_v1, %v489_v59  ;;  %v591_v26 = vadd.f32 %v590_v2, %v589_v60  ;;  %v603_v27 = vadd.f32 %v602_v3, %v601_v61  ;;  %v503_v28 = vadd.f32 %v502_v20, %v501_v6 }
  0x73   : > { %v515_v29 = vadd.f32 %v514_v21, %v513_v62  ;;  %v568_v30 = vrot.slane %v567_v22, 1  ;;  %v580_v31 = vrot.slane %v579_v23, 1  ;;  %v1742_v35 = vunpack.c.l.bf16 %v1672_v7 }
  0x74   : > { %v527_v32 = vsel %vm338_vm0, %v491_v25, %v479_v24  ;;  %v592_v33 = vrot.slane %v591_v26, 1  ;;  %v604_v34 = vrot.slane %v603_v27, 1  ;;  %v1746_v39 = vunpack.c.l.bf16 %v1674_v8 }
  0x75   : > { %v528_v36 = vsel %vm340_vm1, %v503_v28, %v527_v32  ;;  %v569_v37 = vadd.f32 %v568_v30, %v567_v22  ;;  %v581_v38 = vadd.f32 %v580_v31, %v579_v23  ;;  %v274_v43 = vmul.f32 %v1742_v35, %v1676_v9  ;;  %v984_v22 = vld [vmem:[#allocation2 + $0x8] sm:$0xff] }
  0x76   : > { %v529_v40 = vsel %vm342_vm3, %v515_v29, %v528_v36  ;;  %v593_v41 = vadd.f32 %v592_v33, %v591_v26  ;;  %v605_v42 = vadd.f32 %v604_v34, %v603_v27  ;;  %v276_v7 = vmul.f32 %v1742_v35, %v1690_v15 }
  0x77   : > { %533 = vst [vmem:[#allocation2 + $0x18] sm:$0xf] %v529_v40  ;;  %v617_v44 = vsel %vm431_vm2, %v581_v38, %v569_v37  ;;  %v278_v45 = vmul.f32 %v1742_v35, %v1698_v18  ;;  %v280_v8 = vmul.f32 %v1742_v35, %v1700_v19  ;;  %v282_v46 = vrot.slane %v274_v43, 4 }
  0x78   : > { %v618_v4 = vsel %vm433_vm4, %v593_v41, %v617_v44  ;;  %v367_v47 = vmul.f32 %v1746_v39, %v1676_v9  ;;  %v369_v48 = vmul.f32 %v1746_v39, %v1690_v15  ;;  %v294_v50 = vrot.slane %v276_v7, 4 }
  0x79   : > { %v619_v49 = vsel %vm435_vm5, %v605_v42, %v618_v4  ;;  %v306_v51 = vrot.slane %v278_v45, 4  ;;  %v318_v52 = vrot.slane %v280_v8, 4  ;;  %v283_v53 = vadd.f32 %v282_v46, %v274_v43  ;;  %v1769_v42 = vld [vmem:[%s1648_s11 + $0x20] sm:$0xff] }
  0x7a   : > { %623 = vst [vmem:[#allocation2 + $0x18] sm:$0xf0] %v619_v49  ;;  %v371_v54 = vmul.f32 %v1746_v39, %v1698_v18  ;;  %v373_v55 = vmul.f32 %v1746_v39, %v1700_v19  ;;  %v375_v56 = vrot.slane %v367_v47, 4  ;;  %v295_v5 = vadd.f32 %v294_v50, %v276_v7 }
  0x7b   : > { %v307_v57 = vadd.f32 %v306_v51, %v278_v45  ;;  %v319_v58 = vadd.f32 %v318_v52, %v280_v8  ;;  %v387_v59 = vrot.slane %v369_v48, 4  ;;  %v284_v60 = vrot.slane %v283_v53, 2 }
  0x7c   : > { %v376_v61 = vadd.f32 %v375_v56, %v367_v47  ;;  %v399_v6 = vrot.slane %v371_v54, 4  ;;  %v411_v62 = vrot.slane %v373_v55, 4  ;;  %v296_v63 = vrot.slane %v295_v5, 2 }
  0x7d   : > { %v308_v10 = vrot.slane %v307_v57, 2  ;;  %v320_v0 = vrot.slane %v319_v58, 2  ;;  %v388_v1 = vadd.f32 %v387_v59, %v369_v48  ;;  %v285_v2 = vadd.f32 %v284_v60, %v283_v53 }
  0x7e   : > { %v377_v3 = vrot.slane %v376_v61, 2  ;;  %v400_v20 = vadd.f32 %v399_v6, %v371_v54  ;;  %v412_v21 = vadd.f32 %v411_v62, %v373_v55  ;;  %v297_v23 = vadd.f32 %v296_v63, %v295_v5 }
  0x7f   : > { %v309_v24 = vadd.f32 %v308_v10, %v307_v57  ;;  %v321_v25 = vadd.f32 %v320_v0, %v319_v58  ;;  %v389_v26 = vrot.slane %v388_v1, 2  ;;  %v286_v27 = vrot.slane %v285_v2, 1 }
  0x80   : > { %v378_v28 = vadd.f32 %v377_v3, %v376_v61  ;;  %v401_v29 = vrot.slane %v400_v20, 2  ;;  %v413_v30 = vrot.slane %v412_v21, 2  ;;  %v298_v32 = vrot.slane %v297_v23, 1 }
  0x81   : > { %v986_v31 = vld [vmem:[#allocation2 + $0x18] sm:$0xff]  ;;  %v310_v33 = vrot.slane %v309_v24, 1  ;;  %v322_v34 = vrot.slane %v321_v25, 1  ;;  %v390_v36 = vadd.f32 %v389_v26, %v388_v1  ;;  %v287_v38 = vadd.f32 %v286_v27, %v285_v2 }
  0x82   : > { %v1246_v37 = vpack.c.bf16 %v986_v31, %v984_v22  ;;  %v379_v40 = vrot.slane %v378_v28, 1  ;;  %v402_v41 = vadd.f32 %v401_v29, %v400_v20  ;;  %v299_v43 = vadd.f32 %v298_v32, %v297_v23 }
  0x83   : > { %v311_v44 = vadd.f32 %v310_v33, %v309_v24  ;;  %v323_v7 = vadd.f32 %v322_v34, %v321_v25  ;;  %v391_v45 = vrot.slane %v390_v36, 1  ;;  %v414_v46 = vadd.f32 %v413_v30, %v412_v21 }
  0x84   : > { %1247 = vmatprep.subr.bf16.mxu0 %v1246_v37  ;;  %1254 = vmatprep.subr.bf16.mxu1 %v1246_v37  ;;  %v380_v8 = vadd.f32 %v379_v40, %v378_v28  ;;  %v403_v4 = vrot.slane %v402_v41, 1  ;;  %v1772_v47 = vunpack.c.l.bf16 %v1686_v13  ;;  %v339_v48 = vsel %vm338_vm0, %v299_v43, %v287_v38 }
  0x85   : > { %v392_v49 = vadd.f32 %v391_v45, %v390_v36  ;;  %v1776_v50 = vunpack.c.l.bf16 %v1688_v14  ;;  %v1779_v51 = vunpack.c.h.bf16 %v1769_v42  ;;  %v341_v52 = vsel %vm340_vm1, %v311_v44, %v339_v48  ;;  %v1803_v45 = vld [vmem:[%s1648_s11 + $0x28] sm:$0xff] }
  0x86   : > { %v404_v53 = vadd.f32 %v403_v4, %v402_v41  ;;  %v415_v54 = vrot.slane %v414_v46, 1  ;;  %v460_v55 = vmul.f32 %v1772_v47, %v1676_v9  ;;  %v343_v56 = vsel %vm342_vm3, %v323_v7, %v341_v52 }
  0x87   : > { %v432_v13 = vsel %vm431_vm2, %v392_v49, %v380_v8  ;;  %v462_v5 = vmul.f32 %v1772_v47, %v1690_v15  ;;  %v464_v14 = vmul.f32 %v1772_v47, %v1698_v18  ;;  %349 = vst [vmem:[#allocation2] sm:$0xf] %v343_v56  ;;  %v466_v59 = vmul.f32 %v1772_v47, %v1700_v19  ;;  %v1806_v49 = vld [vmem:[%s1648_s11 + $0x30] sm:$0xff]  ;;  %v1809_v56 = vld [vmem:[%s1648_s11 + $0x38] sm:$0xff] }
  0x88   : > { %v416_v57 = vadd.f32 %v415_v54, %v414_v46  ;;  %v434_v58 = vsel %vm433_vm4, %v404_v53, %v432_v13  ;;  %v468_v60 = vrot.slane %v460_v55, 4  ;;  %v550_v62 = vmul.f32 %v1776_v50, %v1676_v9 }
  0x89   : > { %v480_v61 = vrot.slane %v462_v5, 4  ;;  %v492_v6 = vrot.slane %v464_v14, 4  ;;  %v552_v63 = vmul.f32 %v1776_v50, %v1690_v15  ;;  %v504_v1 = vrot.slane %v466_v59, 4 }
  0x8a   : > { %v436_v10 = vsel %vm435_vm5, %v416_v57, %v434_v58  ;;  %v469_v0 = vadd.f32 %v468_v60, %v460_v55  ;;  %v554_v2 = vmul.f32 %v1776_v50, %v1698_v18  ;;  %v556_v21 = vmul.f32 %v1776_v50, %v1700_v19 }
  0x8b   : > { %442 = vst [vmem:[#allocation2] sm:$0xf0] %v436_v10  ;;  %v481_v3 = vadd.f32 %v480_v61, %v462_v5  ;;  %v493_v20 = vadd.f32 %v492_v6, %v464_v14  ;;  %v558_v22 = vrot.slane %v550_v62, 4  ;;  %v505_v24 = vadd.f32 %v504_v1, %v466_v59 }
  0x8c   : > { %v470_v23 = vrot.slane %v469_v0, 2  ;;  %v570_v9 = vrot.slane %v552_v63, 4  ;;  %v582_v25 = vrot.slane %v554_v2, 4  ;;  %v594_v28 = vrot.slane %v556_v21, 4 }
  0x8d   : > { %v482_v26 = vrot.slane %v481_v3, 2  ;;  %v494_v15 = vrot.slane %v493_v20, 2  ;;  %v559_v27 = vadd.f32 %v558_v22, %v550_v62  ;;  %v506_v30 = vrot.slane %v505_v24, 2 }
  0x8e   : > { %v471_v29 = vadd.f32 %v470_v23, %v469_v0  ;;  %v571_v31 = vadd.f32 %v570_v9, %v552_v63  ;;  %v583_v18 = vadd.f32 %v582_v25, %v554_v2  ;;  %v595_v36 = vadd.f32 %v594_v28, %v556_v21 }
  0x8f   : > { %v483_v32 = vadd.f32 %v482_v26, %v481_v3  ;;  %v495_v33 = vadd.f32 %v494_v15, %v493_v20  ;;  %v560_v34 = vrot.slane %v559_v27, 2  ;;  %v507_v37 = vadd.f32 %v506_v30, %v505_v24 }
  0x90   : > { %v472_v19 = vrot.slane %v471_v29, 1  ;;  %v572_v38 = vrot.slane %v571_v31, 2  ;;  %v584_v40 = vrot.slane %v583_v18, 2  ;;  %v596_v7 = vrot.slane %v595_v36, 2 }
  0x91   : > { %v484_v41 = vrot.slane %v483_v32, 1  ;;  %v496_v43 = vrot.slane %v495_v33, 1  ;;  %v561_v44 = vadd.f32 %v560_v34, %v559_v27  ;;  %v508_v4 = vrot.slane %v507_v37, 1 }
  0x92   : > { %v473_v8 = vadd.f32 %v472_v19, %v471_v29  ;;  %v573_v46 = vadd.f32 %v572_v38, %v571_v31  ;;  %v585_v48 = vadd.f32 %v584_v40, %v583_v18  ;;  %v597_v55 = vadd.f32 %v596_v7, %v595_v36 }
  0x93   : > { %v485_v52 = vadd.f32 %v484_v41, %v483_v32  ;;  %v497_v53 = vadd.f32 %v496_v43, %v495_v33  ;;  %v562_v54 = vrot.slane %v561_v44, 1  ;;  %v509_v13 = vadd.f32 %v508_v4, %v507_v37 }
  0x94   : > { %v574_v5 = vrot.slane %v573_v46, 1  ;;  %v586_v14 = vrot.slane %v585_v48, 1  ;;  %v1812_v57 = vunpack.c.h.bf16 %v1803_v45  ;;  %v598_v60 = vrot.slane %v597_v55, 1 }
  0x95   : > { %v524_v58 = vsel %vm338_vm0, %v485_v52, %v473_v8  ;;  %v563_v59 = vadd.f32 %v562_v54, %v561_v44  ;;  %v1816_v61 = vunpack.c.h.bf16 %v1806_v49  ;;  %v1820_v10 = vunpack.c.h.bf16 %v1809_v56  ;;  %v983_v52 = vld [vmem:[#allocation2] sm:$0xff] }
  0x96   : > { %v525_v6 = vsel %vm340_vm1, %v497_v53, %v524_v58  ;;  %v575_v62 = vadd.f32 %v574_v5, %v573_v46  ;;  %v587_v63 = vadd.f32 %v586_v14, %v585_v48  ;;  %v599_v1 = vadd.f32 %v598_v60, %v597_v55 }
  0x97   : > { %v526_v0 = vsel %vm342_vm3, %v509_v13, %v525_v6  ;;  %v641_v2 = vmul.f32 %v1779_v51, %v1681_v11  ;;  %v643_v3 = vmul.f32 %v1812_v57, %v1681_v11  ;;  %v645_v21 = vmul.f32 %v1816_v61, %v1681_v11 }
  0x98   : > { %532 = vst [vmem:[#allocation2 + $0x10] sm:$0xf] %v526_v0  ;;  %v614_v20 = vsel %vm431_vm2, %v575_v62, %v563_v59  ;;  %v647_v22 = vmul.f32 %v1820_v10, %v1681_v11  ;;  %v730_v23 = vmul.f32 %v1779_v51, %v1684_v12  ;;  %v732_v26 = vmul.f32 %v1812_v57, %v1684_v12 }
  0x99   : > { %v615_v24 = vsel %vm433_vm4, %v587_v63, %v614_v20  ;;  %v654_v9 = vrot.slane %v641_v2, 4  ;;  %v666_v25 = vrot.slane %v643_v3, 4  ;;  %v678_v27 = vrot.slane %v645_v21, 4 }
  0x9a   : > { %v616_v15 = vsel %vm435_vm5, %v599_v1, %v615_v24  ;;  %v690_v28 = vrot.slane %v647_v22, 4  ;;  %v734_v29 = vmul.f32 %v1816_v61, %v1684_v12  ;;  %v736_v31 = vmul.f32 %v1820_v10, %v1684_v12 }
  0x9b   : > { %622 = vst [vmem:[#allocation2 + $0x10] sm:$0xf0] %v616_v15  ;;  %v655_v30 = vadd.f32 %v654_v9, %v641_v2  ;;  %v667_v11 = vadd.f32 %v666_v25, %v643_v3  ;;  %v743_v18 = vrot.slane %v730_v23, 4  ;;  %v679_v32 = vadd.f32 %v678_v27, %v645_v21 }
  0x9c   : > { %v691_v33 = vadd.f32 %v690_v28, %v647_v22  ;;  %v755_v34 = vrot.slane %v732_v26, 4  ;;  %v767_v36 = vrot.slane %v734_v29, 4  ;;  %v779_v40 = vrot.slane %v736_v31, 4 }
  0x9d   : > { %v656_v19 = vrot.slane %v655_v30, 2  ;;  %v668_v37 = vrot.slane %v667_v11, 2  ;;  %v744_v38 = vadd.f32 %v743_v18, %v730_v23  ;;  %v680_v41 = vrot.slane %v679_v32, 2 }
  0x9e   : > { %v692_v43 = vrot.slane %v691_v33, 2  ;;  %v756_v44 = vadd.f32 %v755_v34, %v732_v26  ;;  %v768_v7 = vadd.f32 %v767_v36, %v734_v29  ;;  %v780_v48 = vadd.f32 %v779_v40, %v736_v31 }
  0x9f   : > { %v657_v8 = vadd.f32 %v656_v19, %v655_v30  ;;  %v669_v4 = vadd.f32 %v668_v37, %v667_v11  ;;  %v745_v46 = vrot.slane %v744_v38, 2  ;;  %v681_v53 = vadd.f32 %v680_v41, %v679_v32 }
  0xa0   : > { %v693_v12 = vadd.f32 %v692_v43, %v691_v33  ;;  %v757_v54 = vrot.slane %v756_v44, 2  ;;  %v769_v55 = vrot.slane %v768_v7, 2  ;;  %v781_v58 = vrot.slane %v780_v48, 2 }
  0xa1   : > { %v658_v13 = vrot.slane %v657_v8, 1  ;;  %v670_v5 = vrot.slane %v669_v4, 1  ;;  %v746_v14 = vadd.f32 %v745_v46, %v744_v38  ;;  %v682_v60 = vrot.slane %v681_v53, 1 }
  0xa2   : > { %v985_v59 = vld [vmem:[#allocation2 + $0x10] sm:$0xff]  ;;  %v694_v6 = vrot.slane %v693_v12, 1  ;;  %v758_v62 = vadd.f32 %v757_v54, %v756_v44  ;;  %v770_v63 = vadd.f32 %v769_v55, %v768_v7  ;;  %v782_v25 = vadd.f32 %v781_v58, %v780_v48 }
  0xa3   : > { %v1248_v0 = vpack.c.bf16 %v985_v59, %v983_v52  ;;  %v659_v1 = vadd.f32 %v658_v13, %v657_v8  ;;  %v671_v2 = vadd.f32 %v670_v5, %v669_v4  ;;  %v747_v3 = vrot.slane %v746_v14, 1 }
  0xa4   : > { %v683_v20 = vadd.f32 %v682_v60, %v681_v53  ;;  %v695_v21 = vadd.f32 %v694_v6, %v693_v12  ;;  %v759_v22 = vrot.slane %v758_v62, 1  ;;  %v771_v23 = vrot.slane %v770_v63, 1 }
  0xa5   : > { %1249 = vmatpush1.bf16.msra.mxu0 %v1248_v0  ;;  %1256 = vmatpush1.bf16.msra.mxu1 %v1248_v0  ;;  %v707_v24 = vsel %vm338_vm0, %v671_v2, %v659_v1  ;;  %v748_v9 = vadd.f32 %v747_v3, %v746_v14  ;;  %v1844_v26 = vunpack.c.l.bf16 %v1769_v42  ;;  %v819_v29 = vmul.f32 %v1779_v51, %v1693_v16 }
  0xa6   : > { %v708_v15 = vsel %vm340_vm1, %v683_v20, %v707_v24  ;;  %v760_v27 = vadd.f32 %v759_v22, %v758_v62  ;;  %v772_v28 = vadd.f32 %v771_v23, %v770_v63  ;;  %v783_v11 = vrot.slane %v782_v25, 1 }
  0xa7   : > { %v709_v30 = vsel %vm342_vm3, %v695_v21, %v708_v15  ;;  %v821_v31 = vmul.f32 %v1812_v57, %v1693_v16  ;;  %v823_v18 = vmul.f32 %v1816_v61, %v1693_v16  ;;  %v825_v32 = vmul.f32 %v1820_v10, %v1693_v16 }
  0xa8   : > { %713 = vst [vmem:[#allocation2 + $0x28] sm:$0xf] %v709_v30  ;;  %v796_v42 = vsel %vm431_vm2, %v760_v27, %v748_v9  ;;  %v832_v33 = vrot.slane %v819_v29, 4  ;;  %v908_v34 = vmul.f32 %v1779_v51, %v1696_v17  ;;  %v784_v36 = vadd.f32 %v783_v11, %v782_v25 }
  0xa9   : > { %v797_v19 = vsel %vm433_vm4, %v772_v28, %v796_v42  ;;  %v844_v37 = vrot.slane %v821_v31, 4  ;;  %v856_v38 = vrot.slane %v823_v18, 4  ;;  %v868_v41 = vrot.slane %v825_v32, 4 }
  0xaa   : > { %v833_v40 = vadd.f32 %v832_v33, %v819_v29  ;;  %v910_v43 = vmul.f32 %v1812_v57, %v1696_v17  ;;  %v912_v44 = vmul.f32 %v1816_v61, %v1696_v17  ;;  %v798_v7 = vsel %vm435_vm5, %v784_v36, %v797_v19 }
  0xab   : > { %v845_v16 = vadd.f32 %v844_v37, %v821_v31  ;;  %v857_v8 = vadd.f32 %v856_v38, %v823_v18  ;;  %v914_v51 = vmul.f32 %v1820_v10, %v1696_v17  ;;  %802 = vst [vmem:[#allocation2 + $0x28] sm:$0xf0] %v798_v7  ;;  %v869_v46 = vadd.f32 %v868_v41, %v825_v32 }
  0xac   : > { %v834_v4 = vrot.slane %v833_v40, 2  ;;  %v921_v48 = vrot.slane %v908_v34, 4  ;;  %v933_v52 = vrot.slane %v910_v43, 4  ;;  %v945_v54 = vrot.slane %v912_v44, 4 }
  0xad   : > { %v846_v53 = vrot.slane %v845_v16, 2  ;;  %v858_v12 = vrot.slane %v857_v8, 2  ;;  %v957_v55 = vrot.slane %v914_v51, 4  ;;  %v870_v13 = vrot.slane %v869_v46, 2 }
  0xae   : > { %v835_v57 = vadd.f32 %v834_v4, %v833_v40  ;;  %v922_v5 = vadd.f32 %v921_v48, %v908_v34  ;;  %v934_v61 = vadd.f32 %v933_v52, %v910_v43  ;;  %v946_v59 = vadd.f32 %v945_v54, %v912_v44 }
  0xaf   : > { %v847_v14 = vadd.f32 %v846_v53, %v845_v16  ;;  %v859_v58 = vadd.f32 %v858_v12, %v857_v8  ;;  %v958_v60 = vadd.f32 %v957_v55, %v914_v51  ;;  %v871_v62 = vadd.f32 %v870_v13, %v869_v46 }
  0xb0   : > { %v836_v6 = vrot.slane %v835_v57, 1  ;;  %v923_v17 = vrot.slane %v922_v5, 2  ;;  %v935_v10 = vrot.slane %v934_v61, 2  ;;  %v947_v1 = vrot.slane %v946_v59, 2 }
  0xb1   : > { %v848_v63 = vrot.slane %v847_v14, 1  ;;  %v860_v0 = vrot.slane %v859_v58, 1  ;;  %v959_v2 = vrot.slane %v958_v60, 2  ;;  %v872_v20 = vrot.slane %v871_v62, 1 }
  0xb2   : > { %v837_v3 = vadd.f32 %v836_v6, %v835_v57  ;;  %v924_v21 = vadd.f32 %v923_v17, %v922_v5  ;;  %v936_v22 = vadd.f32 %v935_v10, %v934_v61  ;;  %v948_v9 = vadd.f32 %v947_v1, %v946_v59 }
  0xb3   : > { %v849_v23 = vadd.f32 %v848_v63, %v847_v14  ;;  %v861_v24 = vadd.f32 %v860_v0, %v859_v58  ;;  %v960_v25 = vadd.f32 %v959_v2, %v958_v60  ;;  %v873_v15 = vadd.f32 %v872_v20, %v871_v62  ;;  %v988_v63 = vld [vmem:[#allocation2 + $0x28] sm:$0xff] }
  0xb4   : > { %v925_v27 = vrot.slane %v924_v21, 1  ;;  %v937_v28 = vrot.slane %v936_v22, 1  ;;  %v1868_v29 = vunpack.c.l.bf16 %v1803_v45  ;;  %v949_v11 = vrot.slane %v948_v9, 1 }
  0xb5   : > { %v885_v30 = vsel %vm338_vm0, %v849_v23, %v837_v3  ;;  %v961_v31 = vrot.slane %v960_v25, 1  ;;  %v1872_v18 = vunpack.c.l.bf16 %v1806_v49  ;;  %v1876_v34 = vunpack.c.l.bf16 %v1809_v56 }
  0xb6   : > { %v886_v42 = vsel %vm340_vm1, %v861_v24, %v885_v30  ;;  %v926_v32 = vadd.f32 %v925_v27, %v924_v21  ;;  %v938_v33 = vadd.f32 %v937_v28, %v936_v22  ;;  %v950_v19 = vadd.f32 %v949_v11, %v948_v9 }
  0xb7   : > { %v887_v36 = vsel %vm342_vm3, %v873_v15, %v886_v42  ;;  %v962_v37 = vadd.f32 %v961_v31, %v960_v25  ;;  %v640_v45 = vmul.f32 %v1844_v26, %v1742_v35  ;;  %v642_v49 = vmul.f32 %v1868_v29, %v1742_v35 }
  0xb8   : > { %891 = vst [vmem:[#allocation2 + $0x38] sm:$0xf] %v887_v36  ;;  %v974_v38 = vsel %vm431_vm2, %v938_v33, %v926_v32  ;;  %v644_v40 = vmul.f32 %v1872_v18, %v1742_v35  ;;  %v646_v56 = vmul.f32 %v1876_v34, %v1742_v35  ;;  %v729_v44 = vmul.f32 %v1844_v26, %v1746_v39 }
  0xb9   : > { %v975_v41 = vsel %vm433_vm4, %v950_v19, %v974_v38  ;;  %v648_v43 = vrot.slane %v640_v45, 4  ;;  %v731_v7 = vmul.f32 %v1868_v29, %v1746_v39  ;;  %v660_v8 = vrot.slane %v642_v49, 4 }
  0xba   : > { %v976_v16 = vsel %vm435_vm5, %v962_v37, %v975_v41  ;;  %v672_v51 = vrot.slane %v644_v40, 4  ;;  %v684_v4 = vrot.slane %v646_v56, 4  ;;  %v733_v48 = vmul.f32 %v1872_v18, %v1746_v39 }
  0xbb   : > { %980 = vst [vmem:[#allocation2 + $0x38] sm:$0xf0] %v976_v16  ;;  %v649_v46 = vadd.f32 %v648_v43, %v640_v45  ;;  %v735_v35 = vmul.f32 %v1876_v34, %v1746_v39  ;;  %v737_v52 = vrot.slane %v729_v44, 4  ;;  %v661_v53 = vadd.f32 %v660_v8, %v642_v49 }
  0xbc   : > { %v673_v12 = vadd.f32 %v672_v51, %v644_v40  ;;  %v685_v54 = vadd.f32 %v684_v4, %v646_v56  ;;  %v749_v55 = vrot.slane %v731_v7, 4  ;;  %v761_v5 = vrot.slane %v733_v48, 4 }
  0xbd   : > { %v650_v57 = vrot.slane %v649_v46, 2  ;;  %v738_v13 = vadd.f32 %v737_v52, %v729_v44  ;;  %v773_v61 = vrot.slane %v735_v35, 4  ;;  %v662_v14 = vrot.slane %v661_v53, 2 }
  0xbe   : > { %v674_v58 = vrot.slane %v673_v12, 2  ;;  %v686_v59 = vrot.slane %v685_v54, 2  ;;  %v750_v60 = vadd.f32 %v749_v55, %v731_v7  ;;  %v762_v17 = vadd.f32 %v761_v5, %v733_v48 }
  0xbf   : > { %v651_v6 = vadd.f32 %v650_v57, %v649_v46  ;;  %v739_v62 = vrot.slane %v738_v13, 2  ;;  %v774_v10 = vadd.f32 %v773_v61, %v735_v35  ;;  %v663_v0 = vadd.f32 %v662_v14, %v661_v53 }
  0xc0   : > { %v675_v39 = vadd.f32 %v674_v58, %v673_v12  ;;  %v687_v1 = vadd.f32 %v686_v59, %v685_v54  ;;  %v751_v2 = vrot.slane %v750_v60, 2  ;;  %v763_v21 = vrot.slane %v762_v17, 2 }
  0xc1   : > { %v652_v3 = vrot.slane %v651_v6, 1  ;;  %v740_v20 = vadd.f32 %v739_v62, %v738_v13  ;;  %v775_v22 = vrot.slane %v774_v10, 2  ;;  %v664_v24 = vrot.slane %v663_v0, 1 }
  0xc2   : > { %v990_v23 = vld [vmem:[#allocation2 + $0x38] sm:$0xff]  ;;  %v676_v9 = vrot.slane %v675_v39, 1  ;;  %v688_v25 = vrot.slane %v687_v1, 1  ;;  %v752_v15 = vadd.f32 %v751_v2, %v750_v60  ;;  %v764_v11 = vadd.f32 %v763_v21, %v762_v17 }
  0xc3   : > { %v1250_v27 = vpack.c.bf16 %v990_v23, %v988_v63  ;;  %v653_v28 = vadd.f32 %v652_v3, %v651_v6  ;;  %v741_v30 = vrot.slane %v740_v20, 1  ;;  %v665_v31 = vadd.f32 %v664_v24, %v663_v0 }
  0xc4   : > { %v677_v42 = vadd.f32 %v676_v9, %v675_v39  ;;  %v689_v32 = vadd.f32 %v688_v25, %v687_v1  ;;  %v753_v33 = vrot.slane %v752_v15, 1  ;;  %v765_v19 = vrot.slane %v764_v11, 1 }
  0xc5   : > { %1251 = vmatprep.subr.bf16.mxu0 %v1250_v27  ;;  %1255 = vmatprep.subr.bf16.mxu1 %v1250_v27  ;;  %v742_v36 = vadd.f32 %v741_v30, %v740_v20  ;;  %v776_v37 = vadd.f32 %v775_v22, %v774_v10  ;;  %v818_v45 = vmul.f32 %v1844_v26, %v1772_v47  ;;  %vm1003_vm6 = vcmask 261120  }
  0xc6   : > { %v704_v38 = vsel %vm338_vm0, %v665_v31, %v653_v28  ;;  %v754_v49 = vadd.f32 %v753_v33, %v752_v15  ;;  %v820_v40 = vmul.f32 %v1868_v29, %v1772_v47  ;;  %v822_v56 = vmul.f32 %v1872_v18, %v1772_v47 }
  0xc7   : > { %v705_v41 = vsel %vm340_vm1, %v677_v42, %v704_v38  ;;  %v766_v43 = vadd.f32 %v765_v19, %v764_v11  ;;  %v777_v44 = vrot.slane %v776_v37, 1  ;;  %v824_v7 = vmul.f32 %v1876_v34, %v1772_v47 }
  0xc8   : > { %v706_v16 = vsel %vm342_vm3, %v689_v32, %v705_v41  ;;  %v793_v8 = vsel %vm431_vm2, %v754_v49, %v742_v36  ;;  %v826_v51 = vrot.slane %v818_v45, 4  ;;  %v838_v4 = vrot.slane %v820_v40, 4 }
  0xc9   : > { %712 = vst [vmem:[#allocation2 + $0x20] sm:$0xf] %v706_v16  ;;  %v778_v46 = vadd.f32 %v777_v44, %v776_v37  ;;  %v794_v48 = vsel %vm433_vm4, %v766_v43, %v793_v8  ;;  %v850_v35 = vrot.slane %v822_v56, 4  ;;  %v862_v52 = vrot.slane %v824_v7, 4  ;;  %v992_v16 = vld [vmem:[%s1992_s3 + $0x8] sm:$0xff] }
  0xca   : > { %v827_v53 = vadd.f32 %v826_v51, %v818_v45  ;;  %v839_v12 = vadd.f32 %v838_v4, %v820_v40  ;;  %v907_v54 = vmul.f32 %v1844_v26, %v1776_v50  ;;  %v909_v47 = vmul.f32 %v1868_v29, %v1776_v50  ;;  %v991_v45 = vld [vmem:[%s1992_s3] sm:$0xff] }
  0xcb   : > { %v795_v55 = vsel %vm435_vm5, %v778_v46, %v794_v48  ;;  %v851_v57 = vadd.f32 %v850_v35, %v822_v56  ;;  %v863_v13 = vadd.f32 %v862_v52, %v824_v7  ;;  %v911_v5 = vmul.f32 %v1872_v18, %v1776_v50  ;;  %v981_v35 = vld [vmem:[%s1991_s2] sm:$0xff]  ;;  %v982_v52 = vld [vmem:[%s1991_s2 + $0x8] sm:$0xff] }
  0xcc   : > { %801 = vst [vmem:[#allocation2 + $0x20] sm:$0xf0] %v795_v55  ;;  %v828_v61 = vrot.slane %v827_v53, 2  ;;  %v840_v14 = vrot.slane %v839_v12, 2  ;;  %v913_v58 = vmul.f32 %v1876_v34, %v1776_v50  ;;  %v915_v59 = vrot.slane %v907_v54, 4 }
  0xcd   : > { %v852_v60 = vrot.slane %v851_v57, 2  ;;  %v864_v6 = vrot.slane %v863_v13, 2  ;;  %v927_v26 = vrot.slane %v909_v47, 4  ;;  %v939_v62 = vrot.slane %v911_v5, 4 }
  0xce   : > { %v829_v17 = vadd.f32 %v828_v61, %v827_v53  ;;  %v841_v29 = vadd.f32 %v840_v14, %v839_v12  ;;  %v916_v10 = vadd.f32 %v915_v59, %v907_v54  ;;  %v951_v63 = vrot.slane %v913_v58, 4 }
  0xcf   : > { %v853_v0 = vadd.f32 %v852_v60, %v851_v57  ;;  %v865_v39 = vadd.f32 %v864_v6, %v863_v13  ;;  %v928_v1 = vadd.f32 %v927_v26, %v909_v47  ;;  %v940_v2 = vadd.f32 %v939_v62, %v911_v5 }
  0xd0   : > { %v830_v18 = vrot.slane %v829_v17, 1  ;;  %v842_v3 = vrot.slane %v841_v29, 1  ;;  %v917_v20 = vrot.slane %v916_v10, 2  ;;  %v952_v21 = vadd.f32 %v951_v63, %v913_v58 }
  0xd1   : > { %v854_v22 = vrot.slane %v853_v0, 1  ;;  %v866_v23 = vrot.slane %v865_v39, 1  ;;  %v929_v50 = vrot.slane %v928_v1, 2  ;;  %v941_v34 = vrot.slane %v940_v2, 2 }
  0xd2   : > { %v831_v24 = vadd.f32 %v830_v18, %v829_v17  ;;  %v843_v9 = vadd.f32 %v842_v3, %v841_v29  ;;  %v918_v25 = vadd.f32 %v917_v20, %v916_v10  ;;  %v953_v15 = vrot.slane %v952_v21, 2 }
  0xd3   : > { %v855_v27 = vadd.f32 %v854_v22, %v853_v0  ;;  %v867_v28 = vadd.f32 %v866_v23, %v865_v39  ;;  %v930_v30 = vadd.f32 %v929_v50, %v928_v1  ;;  %v942_v11 = vadd.f32 %v941_v34, %v940_v2  ;;  %v987_v4 = vld [vmem:[#allocation2 + $0x20] sm:$0xff] }
  0xd4   : > { %v882_v31 = vsel %vm338_vm0, %v843_v9, %v831_v24  ;;  %v919_v42 = vrot.slane %v918_v25, 1  ;;  %v954_v32 = vadd.f32 %v953_v15, %v952_v21  ;;  %v1455_v37 = vmov 0.0  }
  0xd5   : > { %v883_v33 = vsel %vm340_vm1, %v855_v27, %v882_v31  ;;  %v931_v36 = vrot.slane %v930_v30, 1  ;;  %v943_v19 = vrot.slane %v942_v11, 1  ;;  %1074 = vmatprep.mubr.f32.mxu0 %v1455_v37  ;;  %1080 = vmatprep.mubr.f32.mxu1 %v1455_v37  ;;  %v1456_v43 = vmov 0  }
  0xd6   : > { %v884_v38 = vsel %vm342_vm3, %v867_v28, %v883_v33  ;;  %v920_v49 = vadd.f32 %v919_v42, %v918_v25  ;;  %v955_v40 = vrot.slane %v954_v32, 1  ;;  %1317 = vset.pattern.permute.xlu0 %v1456_v43 }
  0xd7   : > { %890 = vst [vmem:[#allocation2 + $0x30] sm:$0xf] %v884_v38  ;;  %v932_v56 = vadd.f32 %v931_v36, %v930_v30  ;;  %v944_v41 = vadd.f32 %v943_v19, %v942_v11  ;;  %995 = vperm.xlu0 %1317, %v991_v45  }
  0xd8   : > { %v956_v44 = vadd.f32 %v955_v40, %v954_v32 }
  0xd9   : > { %v971_v7 = vsel %vm431_vm2, %v932_v56, %v920_v49 }
  0xda   : > { %v972_v8 = vsel %vm433_vm4, %v944_v41, %v971_v7 }
  0xdb   : > { %v973_v51 = vsel %vm435_vm5, %v956_v44, %v972_v8  ;;  %1000 = vperm.xlu0 %1317, %v992_v16  }
  0xdc   : > { %979 = vst [vmem:[#allocation2 + $0x30] sm:$0xf0] %v973_v51 }
  0xe3   : > { %v989_v46 = vld [vmem:[#allocation2 + $0x30] sm:$0xff] }
  0xe4   : > { %v1252_v48 = vpack.c.bf16 %v989_v46, %v987_v4 }
  0xe6   : > { %1253 = vmatpush1.bf16.msra.mxu0 %v1252_v48  ;;  %1257 = vmatpush1.bf16.msra.mxu1 %v1252_v48 }
  0xe9   : > { %1236 = vmatmul.mubr.msk.f32.vlgmr.msra.gmra.mrb[0].mxu0 %vm1003_vm6, %v981_v35  ;;  %1237 = vmatmul.mubr.msk.f32.vlgmr.msra.gmra.mrb[0].mxu1 %vm1003_vm6, %v982_v52 }
 0x156   : > { %v996_v53 = vpop.permute.xlu0 %995 }
 0x15a   : > { %v1001_v12 = vpop.permute.xlu0 %1000 }
 0x1bc   : > { %v1076_v54 = vpop.f32.mrb[0].mxu0  ;;  %v1082_v47 = vpop.f32.mrb[0].mxu1 }
 0x1bd   : > { %v1077_v55 = vadd.f32 %v1076_v54, %v996_v53  ;;  %v1083_v57 = vadd.f32 %v1082_v47, %v1001_v12  ;;  %v1078_v13 = vpop.f32.mrb[1].mxu0  ;;  %v1084_v5 = vpop.f32.mrb[1].mxu1 }
 0x1be   : > { %v1079_v61 = vadd.f32 %v1078_v13, %v996_v53  ;;  %v1085_v14 = vadd.f32 %v1084_v5, %v1001_v12 }
 0x1bf   : > { %1087 = vst [vmem:[%s255_s13] sm:$0xff] %v1077_v55  ;;  %1089 = vst [vmem:[%s255_s13 + $0x10] sm:$0xff] %v1083_v57 }
 0x1c0   : > { %1088 = vst [vmem:[%s255_s13 + $0x8] sm:$0xff] %v1079_v61  ;;  %1090 = vst [vmem:[%s255_s13 + $0x18] sm:$0xff] %v1085_v14 }
 0x1c1   : > { %1391 = shalt.err (!%p1388_p11)
}
 0x1c2   : > { %s1392_s6 = scalar_lea.hbm %s1946_s14, 512  ;;  %s1396_s22 = scalar_lea.hbm %s1993_s4, 2048 }
 0x1c3   : > { %p1393_p3 = scmp.ne.s32.totalorder %s1946_s14, %s1392_s6  ;;  %p1397_p2 = scmp.lt.u32.totalorder %s1946_s14, %s1993_s4 }
 0x1c4   : > { %p1398_p4 = scmp.lt.u32.totalorder %s1396_s22, %s1392_s6  ;;  %p1400_p12 = scmp.lt.u32.totalorder %s1392_s6, %s1946_s14 }
 0x1c5   : > { %p1394_p8 = pnand %p1393_p3, %p2006_p1 }
 0x1c6   : > { %p1399_p6 = por %p1398_p4, %p1397_p2 }
 0x1c7   : > { %p1395_p0 = pneg %p1394_p8 }
 0x1c8   : > { %p1401_p13 = por %p1400_p12, %p1399_p6 }
 0x1ca   : > { %p1402_p9 = pnand %p1401_p13, %p1395_p0 }
 0x1cc   : > { %1405 = shalt.err (!%p1402_p9)
}
 0x1cd   : > { %s1458_s13 = smov 256   ;;  %s1459_s23 = smov 1024  }
 0x1ce   : > { %s1460_s25 = smov 16  }
 0x1cf   : > { %1262 = dma.vmem_to_hbm [thread:$0]  (%p2006_p1), %s1941_s10, 512, %s1946_s14, %s1092_s19, %s1458_s13, %s1459_s23, %s1460_s25  }
 0x1d0 PF: > { %p1276_p5 = scmp.ge.s32.totalorder %s1448_s18, 2  ;;  %s1120_s11 = sand.u32 1, %s1436_s15  }
 0x1d1   : > { %p2007_p7 = scmp.ne.s32.totalorder %s2000_s28, 0  ;;  %s1121_s29 = scalar_lea.sflag [#allocation5], %s1120_s11 }
 0x1d3   : > { %p1272_p10 = pnand %p1276_p5, %p2007_p7 }
 0x1d5   : > { %1431 = dma.done.wait (!%p1272_p10), %s1121_s29, 512  }
 0x1d6   : > { %1433 = vsyncadd (!%p1272_p10), %s1121_s29, 4294966784  ;;  %p20_p11 = scmp.ge.s32.totalorder %s1511_s21, 6   ;;  %s2008_s15 = smov %s1440_s16 }
 0x1d7   : > { %s2009_s16 = smov %s1444_s17  ;;  %s2010_s17 = smov %s1523_s24 }
 0x1d8   : > { %s2011_s18 = smov %s1511_s21  ;;  %22 = sbr.rel (!%p20_p11) target bundleno = 7 (0x7), region = 98 }
 0x1df   :  { %1126 = vsyncpa [#allocation4], 1 }
 0x1e0   :  { %1128 = vsyncpa [#allocation4 + $0x1], 1 }
 0x1e1   :  { %1129 = vsyncpa [#allocation7], 1 }
 0x1e2   :  { %1131 = vsyncpa [#allocation7 + $0x1], 1 }
 0x1e3   :  { %1132 = vsyncpa [#allocation5], 1 }
 0x1e4   :  { %1134 = vsyncpa [#allocation5 + $0x1], 1 }

</bundles_post_ra>
